<compile_context>
chip_gen: v5e
topology: v5e:2x2
jax: 0.10.0
libtpu: 0.0.40
codegen_flags: <defaults>
</compile_context>

<pallas_src>
import functools

import jax
import jax.numpy as jnp
from jax.experimental import pallas as pl
from jax.experimental.pallas import tpu as pltpu


_VMEM_BLOCK_BUDGET_BYTES = 2 * 1024 * 1024  # per block; ~4x with double-buffering


def _pick_block(size, max_elems, align):
    """Pick a block length along one axis: the full extent if it fits the
    budget, otherwise the largest multiple of `align` that fits (>= align)."""
    if size <= max_elems or size <= align:
        return size
    return max((max_elems // align) * align, align)


def _drop_stripes_kernel(bgn_ref, dist_ref, x_ref, o_ref, *, stripes_num, col_block):
    """One grid step == one (1, row_block, col_block) tile of one batch element.

    bgn_ref, dist_ref : SMEM int32 arrays, shape (B * stripes_num,), in units of
                        the flattened last ("cols") axis.
    x_ref, o_ref      : VMEM refs of shape (1, row_block, col_block).
    """
    b = pl.program_id(0)
    cj = pl.program_id(2)
    col0 = cj * col_block

    # Mask is computed on a 1-D iota along the drop axis only (1, 1, col_block)
    # and broadcast over the row (sublane) axis at the final select.
    idx = col0 + jax.lax.broadcasted_iota(jnp.int32, (1, 1, col_block), 2)

    base = b * stripes_num
    drop = None
    for s in range(stripes_num):  # static unroll; stripes_num is tiny
        lo = bgn_ref[base + s]
        hi = lo + dist_ref[base + s]
        d = (idx >= lo) & (idx < hi)
        drop = d if drop is None else (drop | d)

    x = x_ref[...]
    if drop is None:  # stripes_num == 0 -> identity copy
        o_ref[...] = x
    else:
        o_ref[...] = jnp.where(drop, jnp.array(0, x.dtype), x)


def drop_stripes_pallas(x, bgn, dist, *, dim, donate_x=False):
    """Apply the stripe-zeroing mask (training-mode forward).

    x    : (B, C, T, F) spectrogram
    bgn  : (B, stripes_num) int32 stripe starts (in units of dim `dim`)
    dist : (B, stripes_num) int32 stripe widths
    dim  : 2 (time) or 3 (freq)
    """
    if dim not in (2, 3):
        raise ValueError(f"Invalid argument dim={dim}. (expected 2 or 3)")
    B, C, T, F = x.shape
    S = bgn.shape[1]
    itemsize = jnp.dtype(x.dtype).itemsize

    if dim == 2:
        # Flatten (C, T, F) -> (C, T*F); a time stripe [b, b+d) maps to the
        # contiguous, lane-dense flat range [b*F, (b+d)*F).
        rows, cols = C, T * F
        bgn_c = (bgn.astype(jnp.int32) * F)
        dist_c = (dist.astype(jnp.int32) * F)
    else:
        # Flatten (C, T, F) -> (C*T, F); a freq stripe indexes the lane axis.
        rows, cols = C * T, F
        bgn_c = bgn.astype(jnp.int32)
        dist_c = dist.astype(jnp.int32)

    x3 = x.reshape(B, rows, cols)
    bgn_flat = bgn_c.reshape(-1)    # (B*S,) 1-D SMEM, ~next_pow2(4*B*S) bytes
    dist_flat = dist_c.reshape(-1)

    # VMEM-budgeted tiling (blocks must be full-extent or (8, 128)-aligned).
    max_block_elems = max(1, _VMEM_BLOCK_BUDGET_BYTES // itemsize)
    if dim == 2:
        row_block = rows  # keep the full (small) channel dim
        col_block = _pick_block(cols, max_block_elems // max(rows, 1), 128)
    else:
        col_block = cols  # mask spans the full freq axis
        row_block = _pick_block(rows, max_block_elems // max(cols, 1), 8)

    grid = (B, pl.cdiv(rows, row_block), pl.cdiv(cols, col_block))

    kernel = functools.partial(
        _drop_stripes_kernel, stripes_num=S, col_block=col_block)

    out3 = pl.pallas_call(
        kernel,
        out_shape=jax.ShapeDtypeStruct(x3.shape, x3.dtype),
        grid_spec=pltpu.PrefetchScalarGridSpec(
            num_scalar_prefetch=2,
            grid=grid,
            in_specs=[
                pl.BlockSpec((1, row_block, col_block),
                             lambda b, ri, cj, bgn_r, dist_r: (b, ri, cj)),
            ],
            out_specs=pl.BlockSpec((1, row_block, col_block),
                                   lambda b, ri, cj, bgn_r, dist_r: (b, ri, cj)),
        ),
        compiler_params=pltpu.CompilerParams(
            dimension_semantics=("parallel", "parallel", "parallel"),
            vmem_limit_bytes=32 * 1024 * 1024,
        ),
        # Optional donation: reuse x's HBM buffer for the output.
        input_output_aliases=({2: 0} if donate_x else {}),
    )(bgn_flat, dist_flat, x3)

    return out3.reshape(B, C, T, F)


def sample_stripes(key, *, batch_size, total_width, drop_width, stripes_num):
    """Mirror the PyTorch _transform_slice sampling per batch element."""
    # TODO(synk): torch.randint's host-side RNG stream has no JAX equivalent;
    # we match the distribution (not the exact bit stream) with jax.random.
    drop_width_eff = max(min(drop_width, total_width), 1)
    k_dist, k_bgn = jax.random.split(key)
    # distance ~ U{0, ..., drop_width_eff - 1}
    dist = jax.random.randint(
        k_dist, (batch_size, stripes_num), 0, drop_width_eff, dtype=jnp.int32)
    # bgn ~ U{0, ..., total_width - distance - 1}
    bgn = jax.random.randint(
        k_bgn, (batch_size, stripes_num), 0, total_width - dist, dtype=jnp.int32)
    return bgn, dist


def drop_stripes_forward(x, key, *, dim, drop_width, stripes_num, training=True):
    """Full DropStripes forward (2-D / 3-D / 4-D input). Eval mode = identity."""
    if drop_width <= 0:
        raise ValueError(f"Invalid argument drop_width={drop_width!r}.")
    if not training:
        return x
    orig_ndim = x.ndim
    if x.ndim == 2:
        x4 = x[None, None]
    elif x.ndim == 3:
        x4 = x[None]
    elif x.ndim == 4:
        x4 = x
    else:
        raise ValueError(f"Invalid number of dimensions: {x.ndim}")
    total_width = x4.shape[dim]
    if total_width == 0:
        return x
    bgn, dist = sample_stripes(
        key, batch_size=x4.shape[0], total_width=total_width,
        drop_width=drop_width, stripes_num=stripes_num)
    out4 = drop_stripes_pallas(x4, bgn, dist, dim=dim)
    if orig_ndim == 2:
        return out4[0, 0]
    if orig_ndim == 3:
        return out4[0]
    return out4


def _reference(x, bgn, dist, dim):
    """Pure-JAX reference for a sanity check."""
    idx = jax.lax.broadcasted_iota(jnp.int32, x.shape, dim)
    bidx = jax.lax.broadcasted_iota(jnp.int32, x.shape, 0)
    keep = jnp.ones(x.shape, dtype=jnp.bool_)
    B, S = bgn.shape
    for b in range(B):
        for s in range(S):
            lo = bgn[b, s]
            hi = lo + dist[b, s]
            drop = (idx >= lo) & (idx < hi) & (bidx == b)
            keep = keep & jnp.logical_not(drop)
    return jnp.where(keep, x, jnp.zeros_like(x))


if __name__ == "__main__":
    # Module hyper-parameters (synthetic, deterministic).
    DROP_WIDTH = 4
    STRIPES_NUM = 2

    B, C, T, F = 2, 4, 16, 16
    key = jax.random.PRNGKey(0)
    k_x, k_t, k_f = jax.random.split(key, 3)
    x = jax.random.normal(k_x, (B, C, T, F), dtype=jnp.float32)

    # dim=2 (time stripes)
    bgn_t, dist_t = sample_stripes(
        k_t, batch_size=B, total_width=T,
        drop_width=DROP_WIDTH, stripes_num=STRIPES_NUM)
    out_t = jax.block_until_ready(drop_stripes_pallas(x, bgn_t, dist_t, dim=2))
    ref_t = _reference(x, bgn_t, dist_t, 2)
    assert out_t.shape == x.shape and out_t.dtype == x.dtype
    assert jnp.allclose(out_t, ref_t), "Pallas DropStripes (dim=2) mismatch"

    # dim=3 (freq stripes)
    bgn_f, dist_f = sample_stripes(
        k_f, batch_size=B, total_width=F,
        drop_width=DROP_WIDTH, stripes_num=STRIPES_NUM)
    out_f = jax.block_until_ready(drop_stripes_pallas(x, bgn_f, dist_f, dim=3))
    ref_f = _reference(x, bgn_f, dist_f, 3)
    assert out_f.shape == x.shape and out_f.dtype == x.dtype
    assert jnp.allclose(out_f, ref_f), "Pallas DropStripes (dim=3) mismatch"

    print("KERNEL_OK")
</pallas_src>

<mosaic_0001>
module attributes {stable_mosaic.version = 11 : i64} {
  func.func @_drop_stripes_kernel(%arg0: i32, %arg1: i32, %arg2: i32, %arg3: memref<4xi32, #tpu.memory_space<smem>>, %arg4: memref<4xi32, #tpu.memory_space<smem>>, %arg5: memref<1x4x256xf32, #tpu.memory_space<vmem>>, %arg6: memref<1x4x256xf32, #tpu.memory_space<vmem>>) attributes {dimension_semantics = [#tpu.dimension_semantics<parallel>, #tpu.dimension_semantics<parallel>, #tpu.dimension_semantics<parallel>], iteration_bounds = array<i64: 2, 1, 1>, scalar_prefetch = 2 : i64, scratch_operands = 0 : i64, tpu.core_type = #tpu.core_type<tc>, window_params = [{transform_indices = @transform_0, window_bounds = array<i64: 1, 4, 256>}, {transform_indices = @transform_1, window_bounds = array<i64: 1, 4, 256>}]} {
    %c256_i32 = arith.constant 256 : i32
    %0 = arith.muli %arg2, %c256_i32 : i32
    %1 = tpu.iota {dimensions = array<i32: 2>} : vector<1x1x256xi32>
    %2 = vector.broadcast %0 : i32 to vector<1x1x256xi32>
    %3 = arith.addi %2, %1 : vector<1x1x256xi32>
    %c2_i32 = arith.constant 2 : i32
    %4 = arith.muli %arg0, %c2_i32 : i32
    %c0_i32 = arith.constant 0 : i32
    %5 = arith.addi %4, %c0_i32 : i32
    %6 = arith.index_cast %5 : i32 to index
    %7 = memref.load %arg3[%6] : memref<4xi32, #tpu.memory_space<smem>>
    %c0_i32_0 = arith.constant 0 : i32
    %8 = arith.addi %4, %c0_i32_0 : i32
    %9 = arith.index_cast %8 : i32 to index
    %10 = memref.load %arg4[%9] : memref<4xi32, #tpu.memory_space<smem>>
    %11 = arith.addi %7, %10 : i32
    %12 = vector.broadcast %7 : i32 to vector<1x1x256xi32>
    %13 = arith.cmpi sge, %3, %12 : vector<1x1x256xi32>
    %14 = vector.broadcast %11 : i32 to vector<1x1x256xi32>
    %15 = arith.cmpi slt, %3, %14 : vector<1x1x256xi32>
    %16 = arith.andi %13, %15 : vector<1x1x256xi1>
    %c1_i32 = arith.constant 1 : i32
    %17 = arith.addi %4, %c1_i32 : i32
    %18 = arith.index_cast %17 : i32 to index
    %19 = memref.load %arg3[%18] : memref<4xi32, #tpu.memory_space<smem>>
    %c1_i32_1 = arith.constant 1 : i32
    %20 = arith.addi %4, %c1_i32_1 : i32
    %21 = arith.index_cast %20 : i32 to index
    %22 = memref.load %arg4[%21] : memref<4xi32, #tpu.memory_space<smem>>
    %23 = arith.addi %19, %22 : i32
    %24 = vector.broadcast %19 : i32 to vector<1x1x256xi32>
    %25 = arith.cmpi sge, %3, %24 : vector<1x1x256xi32>
    %26 = vector.broadcast %23 : i32 to vector<1x1x256xi32>
    %27 = arith.cmpi slt, %3, %26 : vector<1x1x256xi32>
    %28 = arith.andi %25, %27 : vector<1x1x256xi1>
    %29 = arith.ori %16, %28 : vector<1x1x256xi1>
    %c0 = arith.constant 0 : index
    %c0_2 = arith.constant 0 : index
    %c0_3 = arith.constant 0 : index
    %30 = vector.load %arg5[%c0, %c0_2, %c0_3] : memref<1x4x256xf32, #tpu.memory_space<vmem>>, vector<1x4x256xf32>
    %cst = arith.constant 0.000000e+00 : f32
    %31 = vector.shape_cast %29 : vector<1x1x256xi1> to vector<1x1x256xi1>
    %32 = vector.broadcast %31 : vector<1x1x256xi1> to vector<1x4x256xi1>
    %33 = vector.broadcast %cst : f32 to vector<1x4x256xf32>
    %34 = arith.select %32, %33, %30 : vector<1x4x256xi1>, vector<1x4x256xf32>
    %c0_4 = arith.constant 0 : index
    %c0_5 = arith.constant 0 : index
    %c0_6 = arith.constant 0 : index
    %35 = vector.load %arg6[%c0_4, %c0_5, %c0_6] : memref<1x4x256xf32, #tpu.memory_space<vmem>>, vector<1x4x256xf32>
    tpu.vector_store %arg6[%c0_4, %c0_5, %c0_6], %34 {strides = array<i32>} : memref<1x4x256xf32, #tpu.memory_space<vmem>>, vector<1x4x256xf32>,
    return
  }
  func.func @transform_0(%arg0: i32, %arg1: i32, %arg2: i32, %arg3: memref<4xi32, #tpu.memory_space<smem>>, %arg4: memref<4xi32, #tpu.memory_space<smem>>) -> (i32, i32, i32) {
    %c0_i32 = arith.constant 0 : i32
    return %arg0, %arg1, %arg2 : i32, i32, i32
  }
  func.func @transform_1(%arg0: i32, %arg1: i32, %arg2: i32, %arg3: memref<4xi32, #tpu.memory_space<smem>>, %arg4: memref<4xi32, #tpu.memory_space<smem>>) -> (i32, i32, i32) {
    %c0_i32 = arith.constant 0 : i32
    return %arg0, %arg1, %arg2 : i32, i32, i32
  }
}

</mosaic_0001>

<bundles_post_ra>
// kernel: tpu_custom_call.1
= control target key start
LH: loop header
LB: loop body
LE: loop exit
PB: predicated region body
PF: predicated region fallthrough
CT: control target
= control target key end

     0   :  { %s570_s18 = smov [#allocation3]   ;;  %s571_s19 = smov [#allocation4]   ;;  %s729_s0 = inlined_call_operand.hbm [shape: s32[4], index: 0, kind: input, shape index: {}]   ;;  %s730_s2 = inlined_call_operand.hbm [shape: f32[2,4,256], index: 2, kind: input, shape index: {}]   ;;  %s731_s3 = inlined_call_operand.hbm [shape: f32[2,4,256], index: 3, kind: output, shape index: {}]   ;;  %s732_s1 = inlined_call_operand.hbm [shape: s32[4], index: 1, kind: input, shape index: {}]  }
   0x1   :  { %s9_s14 = sshll.u32 %s729_s0, 4  ;;  %s14_s17 = sshll.u32 %s732_s1, 4  ;;  %s10_s14 = int_to_ptr.hbm [resolvable:$true] %s9_s14  ;;  %s15_s17 = int_to_ptr.hbm [resolvable:$true] %s14_s17 }
   0x2   :  { %12 = dma.hbm_to_smem %s10_s14, 16, %s570_s18, [#allocation2] }
   0x3   :  { %17 = dma.hbm_to_smem %s15_s17, 16, %s571_s19, [#allocation2] }
   0x4   :  { %536 = dma.done.wait [#allocation2], 32 }
   0x5   :  { %537 = vsyncadd [#allocation2], 4294967264 }
   0x6   :  { %20 = sfence }
   0x7   :  { %21 = vsyncpa [#allocation6], 0 }
   0x8   :  { %23 = vsyncpa [#allocation6 + $0x1], 0 }
   0x9   :  { %24 = vsyncpa [#allocation7], 0 }
   0xa   :  { %26 = vsyncpa [#allocation7 + $0x1], 0  ;;  %s598_s20 = smov 0   ;;  %s600_s0 = smov 0  }
   0xb   :  { %s602_s21 = smov 0   ;;  %s604_s1 = smov 0  }
   0xc   :  { %s606_s22 = smov 0   ;;  %s608_s23 = smov 0  }
   0xd LB: > { %s348_s24 = sadd.s32 4294967295, %s568_s23   ;;  %s349_s25 = sadd.s32 4294967294, %s568_s23   ;;  %s568_s23 = sphi %s608_s23, %s32_s23   ;;  %s564_s22 = sphi %s606_s22, %s743_s22   ;;  %s560_s1 = sphi %s604_s1, %s742_s1   ;;  %s556_s21 = sphi %s602_s21, %s741_s21   ;;  %s552_s0 = sphi %s600_s0, %s740_s0   ;;  %s548_s20 = sphi %s598_s20, %s739_s20  }
   0xe   : > { %s51_s26 = sadd.s32 1, %s564_s22  ;;  %s62_s27 = sadd.s32 1, %s556_s21 }
   0xf   : > { %p53_p0 = scmp.ge.s32.totalorder %s51_s26, 2  ;;  %p69_p1 = scmp.ne.s32.totalorder %s556_s21, %s552_s0 }
  0x10   : > { %p70_p2 = scmp.eq.s32.totalorder %s568_s23, 0  ;;  %p75_p3 = scmp.ne.s32.totalorder %s552_s0, %s548_s20 }
  0x11   : > { %s745_s26 = smov (%p53_p0, %s51_s26), 0  ;;  %p76_p5 = scmp.eq.s32.totalorder %s348_s24, 0 }
  0x12   : > { %p639_p4 = por %p70_p2, %p69_p1  ;;  %s55_s29 = ssub.s32 %s564_s22, %s745_s26 }
  0x13   : > { %p103_p6 = scmp.eq.s32.totalorder %s348_s24, 1  ;;  %p60_p7 = scmp.eq.s32.totalorder %s55_s29, 0 }
  0x14   : > { %p645_p8 = por %p76_p5, %p75_p3  ;;  %p109_p10 = scmp.eq.s32.totalorder %s349_s25, 1 }
  0x15   : > { %p649_p9 = por %p103_p6, %p69_p1  ;;  %p351_p12 = scmp.ge.s32.totalorder %s568_s23, 2 }
  0x16   : > { %s654_s5 = scalar_select %p60_p7, %s556_s21, %s62_s27  }
  0x17   : > { %p656_p11 = por %p109_p10, %p75_p3  ;;  %p378_p13 = scmp.lt.s32.totalorder %s568_s23, 2 }
  0x18   : > { %s129_s7 = sand.u32 1, %s556_s21   ;;  %s364_s9 = sshll.u32 %s564_s22, 3 }
  0x19   : > { %s352_s8 = sshll.u32 %s129_s7, 3  ;;  %s142_s12 = scalar_lea.hbm %s730_s2, %s364_s9 }
  0x1a   : > { %s133_s13 = scalar_lea.vmem [#allocation5], %s352_s8  ;;  %s144_s15 = sshll.u32 %s142_s12, 4  ;;  %s145_s15 = int_to_ptr.hbm [resolvable:$true] %s144_s15 }
  0x1b   : > { %s146_s14 = sshll.u32 %s133_s13, 4  ;;  %p371_p0 = pnand %p378_p13, %p639_p4  ;;  %s147_s14 = int_to_ptr.vmem [resolvable:$true] %s146_s14 }
  0x1c   : > { %p355_p1 = scmp.ge.s32.totalorder %s568_s23, 1  ;;  %p151_p2 = scmp.lt.s32.totalorder %s568_s23, 3 }
  0x1d   : > { %s130_s16 = scalar_lea.sflag [#allocation6], %s129_s7 }
  0x1e   : > { %373 = dma.hbm_to_vmem [thread:$0]  (!%p371_p0), %s145_s15, 128, %s147_s14, %s130_s16  }
  0x1f   : > { %p152_p3 = pnand %p355_p1, %p151_p2 }
  0x20   : > { %s672_s17 = sand.u32 (!%p152_p3), 1, %s552_s0  }
  0x21   : > { %155 = sbr.rel (%p152_p3) target bundleno = 63 (0x3f), region = 24  ;;  %s356_s18 = sshll.u32 (!%p152_p3), %s672_s17, 3 }
  0x22   : > { %s158_s19 = scalar_lea.sflag (!%p152_p3), [#allocation6], %s672_s17  ;;  %s161_s24 = scalar_lea.vmem (!%p152_p3), [#allocation5], %s356_s18 }
  0x26   : > { %539 = dma.done.wait (%p645_p8), %s158_s19, 128  }
  0x27   : > { %541 = vsyncadd (%p645_p8), %s158_s19, 4294967168  ;;  %v184_v0 = vlaneseq  ;;  %s358_s25 = sshll.u32 %s560_s1, 1  ;;  %v216_v3 = vld [vmem:[%s161_s24] sm:$0xff]  ;;  %s365_s10 = sshll.u32 %s560_s1, 3  ;;  %vm232_vm14 = vcmask 1043456  }
  0x28   : > { %s191_s27 = sld [smem:[#allocation3 + %s358_s25]]  ;;  %s202_s28 = sadd.s32 1, %s358_s25  ;;  %222 = vst [vmem:[#allocation1] ss:$2 sm:$0xff] %v216_v3 }
  0x29   : > { %v185_v1 = vand.u32 127, %v184_v0  ;;  %s192_s29 = sld [smem:[#allocation4 + %s358_s25]]  ;;  %s252_s13 = scalar_lea.hbm %s731_s3, %s365_s10 }
  0x2a   : > { %s203_s7 = sld [smem:[#allocation3 + %s202_s28]]  ;;  %s180_s1 = scalar_lea.vmem [#allocation8], %s356_s18 }
  0x2b   : > { %s204_s8 = sld [smem:[#allocation4 + %s202_s28]]  ;;  %v186_v2 = vadd.s32 128, %v185_v1  ;;  %s254_s14 = sshll.u32 %s180_s1, 4  ;;  %s255_s14 = int_to_ptr.vmem [resolvable:$true] %s254_s14 }
  0x2c   : > { %s256_s15 = sshll.u32 %s252_s13, 4  ;;  %s237_s16 = scalar_lea.sflag [#allocation7], %s672_s17  ;;  %s257_s15 = int_to_ptr.hbm [resolvable:$true] %s256_s15 }
  0x2d   : > { %s498_s19 = sshra.s32 %s257_s15, 4  ;;  %s499_s19 = int_to_ptr.hbm [resolvable:$true] %s498_s19 }
  0x2e   : > { %v194_v4 = vstv %s191_s27  ;;  %s500_s24 = scalar_lea.hbm %s499_s19, 8  ;;  %p505_p7 = scmp.lt.s32.totalorder %s499_s19, %s731_s3 }
  0x2f   : > { %s193_s9 = sadd.s32 %s192_s29, %s191_s27  ;;  %vm195_vm0 = vcmp.ge.s32.totalorder %v185_v1, %v194_v4  ;;  %vm196_vm1 = vcmp.ge.s32.totalorder %v186_v2, %v194_v4  ;;  %v224_v9 = vld.sshfl [vmem:[#allocation1 + $0x8] sm:$0xff pattern:$0x75316420]  ;;  %v223_v10 = vld.sshfl [vmem:[#allocation1] sm:$0xff pattern:$0x75316420]  ;;  %p501_p4 = scmp.ne.s32.totalorder %s499_s19, %s500_s24 }
  0x30   : > { %v197_v5 = vstv %s193_s9  ;;  %v206_v6 = vstv %s203_s7  ;;  %s504_s27 = scalar_lea.hbm %s731_s3, 16 }
  0x31   : > { %vm198_vm2 = vcmp.lt.s32.totalorder %v185_v1, %v197_v5  ;;  %vm199_vm3 = vcmp.lt.s32.totalorder %v186_v2, %v197_v5  ;;  %s205_s30 = sadd.s32 %s204_s8, %s203_s7  ;;  %vm207_vm4 = vcmp.ge.s32.totalorder %v185_v1, %v206_v6  ;;  %vm208_vm6 = vcmp.ge.s32.totalorder %v186_v2, %v206_v6  ;;  %p502_p5 = pnand %p501_p4, %p649_p9 }
  0x32   : > { %vm684_vm5 = vmand %vm195_vm0, %vm198_vm2  ;;  %v209_v8 = vstv %s205_s30  ;;  %p506_p8 = scmp.lt.s32.totalorder %s504_s27, %s500_s24 }
  0x33   : > { %vm201_vm7 = vmand %vm196_vm1, %vm199_vm3  ;;  %vm210_vm8 = vcmp.lt.s32.totalorder %v185_v1, %v209_v8  ;;  %vm211_vm9 = vcmp.lt.s32.totalorder %v186_v2, %v209_v8  ;;  %p503_p6 = pneg %p502_p5 }
  0x34   : > { %vm212_vm10 = vmand %vm207_vm4, %vm210_vm8  ;;  %p507_p10 = por %p506_p8, %p505_p7 }
  0x35   : > { %vm213_vm11 = vmand %vm208_vm6, %vm211_vm9 }
  0x36   : > { %vm214_vm12 = vmor %vm684_vm5, %vm212_vm10  ;;  %p508_p13 = pnand %p507_p10, %p503_p6 }
  0x37   : > { %vm215_vm13 = vmor %vm201_vm7, %vm213_vm11  ;;  %v227_v13 = vsel %vm214_vm12, 0.0, %v223_v10 }
  0x38   : > { %v228_v11 = vsel %vm215_vm13, 0.0, %v224_v9 }
  0x39   : > { %v231_v12 = vrot.slane %v228_v11, 4 }
  0x3b   : > { %v233_v14 = vsel %vm232_vm14, %v227_v13, %v231_v12 }
  0x3c   : > { %235 = vst [vmem:[%s180_s1] sm:$0xff] %v233_v14 }
  0x3d   : > { %511 = shalt.err (!%p508_p13)
}
  0x3e   : > { %368 = dma.vmem_to_hbm [thread:$0]  (%p649_p9), %s255_s14, 128, %s257_s15, %s237_s16  }
  0x3f PF: > { %s268_s17 = sand.u32 1, %s548_s20   ;;  %p375_p0 = pnand %p351_p12, %p656_p11 }
  0x40   : > { %s269_s7 = scalar_lea.sflag [#allocation7], %s268_s17 }
  0x41   : > { %p376_p1 = pneg %p375_p0 }
  0x43   : > { %543 = dma.done.wait (%p376_p1), %s269_s7, 128  }
  0x44   : > { %545 = vsyncadd (%p376_p1), %s269_s7, 4294967168  ;;  %s32_s23 = sadd.s32 1, %s568_s23   ;;  %s739_s20 = smov %s552_s0 }
  0x45   : > { %p29_p2 = scmp.ge.s32.totalorder %s32_s23, 4   ;;  %s740_s0 = smov %s556_s21 }
  0x46   : > { %s741_s21 = smov %s654_s5  ;;  %s742_s1 = smov %s564_s22 }
  0x47   : > { %s743_s22 = smov %s745_s26  ;;  %31 = sbr.rel (!%p29_p2) target bundleno = 13 (0xd), region = 69 }
  0x4c   :  { %275 = vsyncpa [#allocation6], 1 }
  0x4d   :  { %277 = vsyncpa [#allocation6 + $0x1], 1 }
  0x4e   :  { %278 = vsyncpa [#allocation7], 1 }
  0x4f   :  { %280 = vsyncpa [#allocation7 + $0x1], 1 }

</bundles_post_ra>
